<compile_context>
chip_gen: v5e
topology: v5e:2x2
jax: 0.10.0
libtpu: 0.0.40
codegen_flags: <defaults>
</compile_context>

<pallas_src>
import math

import jax
import jax.numpy as jnp
from jax.experimental import pallas as pl
from jax.experimental.pallas import tpu as pltpu


# Conservative resident-table budget so this path is safe on every generation
# (v7x: 64 MiB physical VMEM per TensorCore; v5e/v6e: 128 MiB).
_RESIDENT_VMEM_BUDGET = 40 * 1024 * 1024
_MAX_BLOCK_ROWS = 128  # rows gathered per grid step (multiple of 8)


def _round_up(x: int, m: int) -> int:
    return ((x + m - 1) // m) * m


def build_sinusoidal_table(n_ctx: int, n_embd: int) -> jnp.ndarray:
    """Plain-JAX reproduction of PositionalEmbedding.initialize()."""
    assert n_embd % 2 == 0, "Embedding dimension should be even"
    pos = jnp.arange(n_ctx, dtype=jnp.float32)[:, None]                 # (n_ctx, 1)
    div = jnp.exp(
        -2.0
        * jnp.arange(n_embd // 2, dtype=jnp.float32)
        * (1.0 / n_embd)
        * math.log(10000.0)
    )                                                                   # (n_embd/2,)
    arg = pos * div                                                     # (n_ctx, n_embd/2)
    mat = jnp.zeros((n_ctx, n_embd), dtype=jnp.float32)
    mat = mat.at[:, 0::2].set(jnp.sin(arg))
    mat = mat.at[:, 1::2].set(jnp.cos(arg))
    return mat


# ---------------------------------------------------------------------------
# Primary path: VMEM-resident table, batched (TQ, n_embd) row gather per step.
# ---------------------------------------------------------------------------
def _gather_block_kernel(ids_ref, mat_ref, out_ref):
    """out_ref[r, :] = mat_ref[ids[block*TQ + r], :] for one (TQ, n_embd) block.

    ids_ref : SMEM (padded_seq,) int32   (scalar prefetch)
    mat_ref : VMEM (n_ctx, n_embd)       (whole table, resident across grid steps)
    out_ref : VMEM (TQ, n_embd)          (dense output row block)
    """
    tq = out_ref.shape[0]
    base = pl.program_id(0) * tq
    # Static (sublane-dense) store offsets; dynamic table-row loads from the
    # resident VMEM table.  One dense block writeback per grid step.
    for r in range(tq):
        idx = ids_ref[base + r]
        out_ref[pl.ds(r, 1), :] = mat_ref[pl.ds(idx, 1), :]


def _lookup_resident(mat, ids, tq, padded_seq, vmem_limit):
    n_ctx, n_embd = mat.shape
    num_blocks = padded_seq // tq
    grid_spec = pltpu.PrefetchScalarGridSpec(
        num_scalar_prefetch=1,
        grid=(num_blocks,),
        in_specs=[
            # Whole table, constant block index -> DMA'd once, stays resident.
            pl.BlockSpec((n_ctx, n_embd), lambda i, ids_ref: (0, 0)),
        ],
        out_specs=pl.BlockSpec((tq, n_embd), lambda i, ids_ref: (i, 0)),
    )
    return pl.pallas_call(
        _gather_block_kernel,
        out_shape=jax.ShapeDtypeStruct((padded_seq, n_embd), mat.dtype),
        grid_spec=grid_spec,
        compiler_params=pltpu.CompilerParams(
            dimension_semantics=("parallel",),  # disjoint row blocks; 2 TCs on v7x
            vmem_limit_bytes=vmem_limit,
        ),
    )(ids, mat)


# ---------------------------------------------------------------------------
# Fallback path (table too large for VMEM): per-row data-dependent DMA gather.
# ---------------------------------------------------------------------------
def _gather_row_kernel(ids_ref, row_ref, out_ref):
    # row_ref already holds mat[x[i]] for this grid step (data-dependent DMA).
    del ids_ref
    out_ref[...] = row_ref[...]


def _lookup_hbm_gather(mat, ids):
    n_ctx, n_embd = mat.shape
    (seq,) = ids.shape
    grid_spec = pltpu.PrefetchScalarGridSpec(
        num_scalar_prefetch=1,
        grid=(seq,),
        in_specs=[pl.BlockSpec((1, n_embd), lambda i, ids_ref: (ids_ref[i], 0))],
        out_specs=pl.BlockSpec((1, n_embd), lambda i, ids_ref: (i, 0)),
    )
    # TODO(synk): for very large tables, replace this per-row BlockSpec DMA with a
    # manual multi-row async-copy gather (4-8 in-flight pltpu.make_async_copy into
    # VMEM scratch + one dense blocked writeback) and/or deeper input buffering.
    return pl.pallas_call(
        _gather_row_kernel,
        out_shape=jax.ShapeDtypeStruct((seq, n_embd), mat.dtype),
        grid_spec=grid_spec,
        compiler_params=pltpu.CompilerParams(dimension_semantics=("arbitrary",)),
    )(ids, mat)


def positional_embedding_lookup(mat, x, *, block_rows=_MAX_BLOCK_ROWS,
                                force_hbm_gather=False):
    """out[i, :] = mat[x[i], :]  (same semantics as torch `mat[x]`)."""
    n_ctx, n_embd = mat.shape
    (seq,) = x.shape
    itemsize = jnp.dtype(mat.dtype).itemsize

    # Clamp: in-kernel VMEM reads have no hardware bounds check, so malformed
    # indices must not be allowed to read stale memory.
    ids = jnp.clip(x.astype(jnp.int32), 0, n_ctx - 1)

    # Row-block size: multiple of 8 (sublane-dense output block), capped.
    tq = min(_round_up(max(seq, 1), 8), _round_up(block_rows, 8))
    padded_seq = _round_up(seq, tq)

    table_bytes = n_ctx * n_embd * itemsize
    block_out_bytes = tq * n_embd * itemsize
    needed = 2 * table_bytes + 2 * block_out_bytes + (1 << 20)

    if force_hbm_gather or needed > _RESIDENT_VMEM_BUDGET:
        return _lookup_hbm_gather(mat, ids)

    if padded_seq != seq:
        # Padded rows gather row 0 and are sliced off afterwards.
        ids = jnp.pad(ids, (0, padded_seq - seq))

    vmem_limit = int(min(48 * 1024 * 1024, max(32 * 1024 * 1024, needed)))
    out = _lookup_resident(mat, ids, tq, padded_seq, vmem_limit)
    return out[:seq] if padded_seq != seq else out


class PositionalEmbeddingPallas:
    """Mirrors the PyTorch module: keeps a table, regrows it if len(x) > n_ctx."""

    def __init__(self, n_embd: int, n_ctx: int):
        assert n_embd % 2 == 0, "Embedding dimension should be even"
        self.n_embd = n_embd
        self.initialize(n_ctx)

    def initialize(self, n_ctx: int):
        self.n_ctx = n_ctx
        self.mat = build_sinusoidal_table(n_ctx, self.n_embd)

    def __call__(self, x: jnp.ndarray) -> jnp.ndarray:
        # NOTE: regrowth is an eager / Python-level decision (same as the torch
        # module); it will not re-trigger if this object is captured inside a jit
        # with a fixed table.
        if x.shape[0] > self.n_ctx:
            self.initialize(x.shape[0])
        return positional_embedding_lookup(self.mat, x)


if __name__ == "__main__":
    # Small deterministic example: n_ctx=16 positions, n_embd=128 (lane-dense),
    # a sequence of 8 integer position indices.
    n_ctx, n_embd, seq = 16, 128, 8

    key = jax.random.PRNGKey(0)
    x = jax.random.randint(key, (seq,), 0, n_ctx, dtype=jnp.int32)

    module = PositionalEmbeddingPallas(n_embd=n_embd, n_ctx=n_ctx)
    out = jax.block_until_ready(module(x))

    # Reference check against plain-JAX gather (same semantics as torch mat[x]).
    ref = module.mat[x]
    assert out.shape == (seq, n_embd)
    assert out.dtype == module.mat.dtype
    assert jnp.allclose(out, ref), "Pallas resident-table gather mismatch vs reference"

    # Also exercise the large-table fallback path (per-row data-dependent DMA gather).
    out_fb = jax.block_until_ready(
        positional_embedding_lookup(module.mat, x, force_hbm_gather=True))
    assert jnp.allclose(out_fb, ref), "Pallas HBM-gather fallback mismatch vs reference"

    print("KERNEL_OK")
</pallas_src>

<mosaic_0001>
module attributes {stable_mosaic.version = 11 : i64} {
  func.func @_gather_block_kernel(%arg0: i32, %arg1: memref<8xi32, #tpu.memory_space<smem>>, %arg2: memref<16x128xf32, #tpu.memory_space<vmem>>, %arg3: memref<8x128xf32, #tpu.memory_space<vmem>>) attributes {dimension_semantics = [#tpu.dimension_semantics<parallel>], iteration_bounds = array<i64: 1>, scalar_prefetch = 1 : i64, scratch_operands = 0 : i64, tpu.core_type = #tpu.core_type<tc>, window_params = [{pipeline_mode = #tpu.pipeline_mode<synchronous>, transform_indices = @transform_0, window_bounds = array<i64: 16, 128>}, {transform_indices = @transform_1, window_bounds = array<i64: 8, 128>}]} {
    %c8_i32 = arith.constant 8 : i32
    %0 = arith.muli %arg0, %c8_i32 : i32
    %c0_i32 = arith.constant 0 : i32
    %1 = arith.addi %0, %c0_i32 : i32
    %2 = arith.index_cast %1 : i32 to index
    %3 = memref.load %arg1[%2] : memref<8xi32, #tpu.memory_space<smem>>
    %4 = arith.index_cast %3 : i32 to index
    %c0 = arith.constant 0 : index
    %5 = vector.load %arg2[%4, %c0] : memref<16x128xf32, #tpu.memory_space<vmem>>, vector<1x128xf32>
    %c0_0 = arith.constant 0 : index
    %c0_1 = arith.constant 0 : index
    %6 = vector.load %arg3[%c0_0, %c0_1] : memref<8x128xf32, #tpu.memory_space<vmem>>, vector<1x128xf32>
    tpu.vector_store %arg3[%c0_0, %c0_1], %5 {strides = array<i32>} : memref<8x128xf32, #tpu.memory_space<vmem>>, vector<1x128xf32>,
    %c1_i32 = arith.constant 1 : i32
    %7 = arith.addi %0, %c1_i32 : i32
    %8 = arith.index_cast %7 : i32 to index
    %9 = memref.load %arg1[%8] : memref<8xi32, #tpu.memory_space<smem>>
    %10 = arith.index_cast %9 : i32 to index
    %c0_2 = arith.constant 0 : index
    %11 = vector.load %arg2[%10, %c0_2] : memref<16x128xf32, #tpu.memory_space<vmem>>, vector<1x128xf32>
    %c1 = arith.constant 1 : index
    %c0_3 = arith.constant 0 : index
    %12 = vector.load %arg3[%c1, %c0_3] : memref<8x128xf32, #tpu.memory_space<vmem>>, vector<1x128xf32>
    tpu.vector_store %arg3[%c1, %c0_3], %11 {strides = array<i32>} : memref<8x128xf32, #tpu.memory_space<vmem>>, vector<1x128xf32>,
    %c2_i32 = arith.constant 2 : i32
    %13 = arith.addi %0, %c2_i32 : i32
    %14 = arith.index_cast %13 : i32 to index
    %15 = memref.load %arg1[%14] : memref<8xi32, #tpu.memory_space<smem>>
    %16 = arith.index_cast %15 : i32 to index
    %c0_4 = arith.constant 0 : index
    %17 = vector.load %arg2[%16, %c0_4] : memref<16x128xf32, #tpu.memory_space<vmem>>, vector<1x128xf32>
    %c2 = arith.constant 2 : index
    %c0_5 = arith.constant 0 : index
    %18 = vector.load %arg3[%c2, %c0_5] : memref<8x128xf32, #tpu.memory_space<vmem>>, vector<1x128xf32>
    tpu.vector_store %arg3[%c2, %c0_5], %17 {strides = array<i32>} : memref<8x128xf32, #tpu.memory_space<vmem>>, vector<1x128xf32>,
    %c3_i32 = arith.constant 3 : i32
    %19 = arith.addi %0, %c3_i32 : i32
    %20 = arith.index_cast %19 : i32 to index
    %21 = memref.load %arg1[%20] : memref<8xi32, #tpu.memory_space<smem>>
    %22 = arith.index_cast %21 : i32 to index
    %c0_6 = arith.constant 0 : index
    %23 = vector.load %arg2[%22, %c0_6] : memref<16x128xf32, #tpu.memory_space<vmem>>, vector<1x128xf32>
    %c3 = arith.constant 3 : index
    %c0_7 = arith.constant 0 : index
    %24 = vector.load %arg3[%c3, %c0_7] : memref<8x128xf32, #tpu.memory_space<vmem>>, vector<1x128xf32>
    tpu.vector_store %arg3[%c3, %c0_7], %23 {strides = array<i32>} : memref<8x128xf32, #tpu.memory_space<vmem>>, vector<1x128xf32>,
    %c4_i32 = arith.constant 4 : i32
    %25 = arith.addi %0, %c4_i32 : i32
    %26 = arith.index_cast %25 : i32 to index
    %27 = memref.load %arg1[%26] : memref<8xi32, #tpu.memory_space<smem>>
    %28 = arith.index_cast %27 : i32 to index
    %c0_8 = arith.constant 0 : index
    %29 = vector.load %arg2[%28, %c0_8] : memref<16x128xf32, #tpu.memory_space<vmem>>, vector<1x128xf32>
    %c4 = arith.constant 4 : index
    %c0_9 = arith.constant 0 : index
    %30 = vector.load %arg3[%c4, %c0_9] : memref<8x128xf32, #tpu.memory_space<vmem>>, vector<1x128xf32>
    tpu.vector_store %arg3[%c4, %c0_9], %29 {strides = array<i32>} : memref<8x128xf32, #tpu.memory_space<vmem>>, vector<1x128xf32>,
    %c5_i32 = arith.constant 5 : i32
    %31 = arith.addi %0, %c5_i32 : i32
    %32 = arith.index_cast %31 : i32 to index
    %33 = memref.load %arg1[%32] : memref<8xi32, #tpu.memory_space<smem>>
    %34 = arith.index_cast %33 : i32 to index
    %c0_10 = arith.constant 0 : index
    %35 = vector.load %arg2[%34, %c0_10] : memref<16x128xf32, #tpu.memory_space<vmem>>, vector<1x128xf32>
    %c5 = arith.constant 5 : index
    %c0_11 = arith.constant 0 : index
    %36 = vector.load %arg3[%c5, %c0_11] : memref<8x128xf32, #tpu.memory_space<vmem>>, vector<1x128xf32>
    tpu.vector_store %arg3[%c5, %c0_11], %35 {strides = array<i32>} : memref<8x128xf32, #tpu.memory_space<vmem>>, vector<1x128xf32>,
    %c6_i32 = arith.constant 6 : i32
    %37 = arith.addi %0, %c6_i32 : i32
    %38 = arith.index_cast %37 : i32 to index
    %39 = memref.load %arg1[%38] : memref<8xi32, #tpu.memory_space<smem>>
    %40 = arith.index_cast %39 : i32 to index
    %c0_12 = arith.constant 0 : index
    %41 = vector.load %arg2[%40, %c0_12] : memref<16x128xf32, #tpu.memory_space<vmem>>, vector<1x128xf32>
    %c6 = arith.constant 6 : index
    %c0_13 = arith.constant 0 : index
    %42 = vector.load %arg3[%c6, %c0_13] : memref<8x128xf32, #tpu.memory_space<vmem>>, vector<1x128xf32>
    tpu.vector_store %arg3[%c6, %c0_13], %41 {strides = array<i32>} : memref<8x128xf32, #tpu.memory_space<vmem>>, vector<1x128xf32>,
    %c7_i32 = arith.constant 7 : i32
    %43 = arith.addi %0, %c7_i32 : i32
    %44 = arith.index_cast %43 : i32 to index
    %45 = memref.load %arg1[%44] : memref<8xi32, #tpu.memory_space<smem>>
    %46 = arith.index_cast %45 : i32 to index
    %c0_14 = arith.constant 0 : index
    %47 = vector.load %arg2[%46, %c0_14] : memref<16x128xf32, #tpu.memory_space<vmem>>, vector<1x128xf32>
    %c7 = arith.constant 7 : index
    %c0_15 = arith.constant 0 : index
    %48 = vector.load %arg3[%c7, %c0_15] : memref<8x128xf32, #tpu.memory_space<vmem>>, vector<1x128xf32>
    tpu.vector_store %arg3[%c7, %c0_15], %47 {strides = array<i32>} : memref<8x128xf32, #tpu.memory_space<vmem>>, vector<1x128xf32>,
    return
  }
  func.func @transform_0(%arg0: i32, %arg1: memref<8xi32, #tpu.memory_space<smem>>) -> (i32, i32) {
    %c0_i32 = arith.constant 0 : i32
    %c0_i32_0 = arith.constant 0 : i32
    %c0_i32_1 = arith.constant 0 : i32
    return %c0_i32, %c0_i32_0 : i32, i32
  }
  func.func @transform_1(%arg0: i32, %arg1: memref<8xi32, #tpu.memory_space<smem>>) -> (i32, i32) {
    %c0_i32 = arith.constant 0 : i32
    %c0_i32_0 = arith.constant 0 : i32
    return %arg0, %c0_i32 : i32, i32
  }
}

</mosaic_0001>

<bundles_post_ra>
// kernel: tpu_custom_call.1
= control target key start
LH: loop header
LB: loop body
LE: loop exit
PB: predicated region body
PF: predicated region fallthrough
CT: control target
= control target key end

     0   :  { %s177_s12 = smov [#allocation3]   ;;  %s206_s0 = inlined_call_operand.hbm [shape: s32[8], index: 0, kind: input, shape index: {}]   ;;  %s207_s1 = inlined_call_operand.hbm [shape: f32[16,128], index: 1, kind: input, shape index: {}]   ;;  %s208_s2 = inlined_call_operand.hbm [shape: f32[8,128], index: 2, kind: output, shape index: {}]  }
   0x1   :  { %s8_s11 = sshll.u32 %s206_s0, 4  ;;  %s9_s11 = int_to_ptr.hbm [resolvable:$true] %s8_s11 }
   0x2   :  { %11 = dma.hbm_to_smem %s9_s11, 16, %s177_s12, [#allocation2] }
   0x3   :  { %171 = dma.done.wait [#allocation2], 16 }
   0x4   :  { %172 = vsyncadd [#allocation2], 4294967280 }
   0x5   :  { %14 = sfence }
   0x6   :  { %15 = vsyncpa [#allocation5], 0 }
   0x7   :  { %16 = vsyncpa [#allocation6], 0  ;;  %s21_s15 = sshll.u32 %s207_s1, 4  ;;  %s178_s16 = smov [#allocation4]   ;;  %s22_s15 = int_to_ptr.hbm [resolvable:$true] %s21_s15 }
   0x8   :  { %s23_s17 = sshll.u32 %s178_s16, 4  ;;  %s179_s18 = smov 128   ;;  %s24_s17 = int_to_ptr.vmem [resolvable:$true] %s23_s17 }
   0x9   :  { %s180_s19 = smov 8  }
   0xa   :  { %29 = dma.hbm_to_vmem [thread:$0]  %s22_s15, 256, %s24_s17, [#allocation5], %s179_s18, %s179_s18, %s180_s19  }
   0xb   :  { %173 = dma.done.wait [#allocation5], 256  }
   0xc   :  { %174 = vsyncadd [#allocation5], 4294967040  ;;  %s35_s0 = sld [smem:[#allocation3]]  ;;  %s181_s29 = smov [#allocation7]  }
   0xd   :  { %s99_s20 = sld [smem:[#allocation3 + $0x1]]  ;;  %s79_s30 = sshll.u32 %s181_s29, 4  ;;  %s80_s30 = int_to_ptr.vmem [resolvable:$true] %s79_s30 }
   0xe   :  { %s100_s21 = sld [smem:[#allocation3 + $0x2]]  ;;  %s81_s6 = sshll.u32 %s208_s2, 4  ;;  %s82_s6 = int_to_ptr.hbm [resolvable:$true] %s81_s6 }
   0xf   :  { %s101_s22 = sld [smem:[#allocation3 + $0x3]] }
  0x10   :  { %s102_s23 = sld [smem:[#allocation3 + $0x4]] }
  0x11   :  { %s103_s24 = sld [smem:[#allocation3 + $0x5]] }
  0x12   :  { %s104_s25 = sld [smem:[#allocation3 + $0x6]]  ;;  %s36_s26 = scalar_lea.vmem [#allocation4], %s35_s0 }
  0x13   :  { %v37_v0 = vld [vmem:[%s36_s26] sm:$0x1]  ;;  %s105_s27 = sld [smem:[#allocation3 + $0x7]]  ;;  %s41_s1 = scalar_lea.vmem [#allocation4], %s99_s20 }
  0x14   :  { %38 = vst [vmem:[#allocation7] sm:$0x1] %v37_v0  ;;  %v42_v1 = vld [vmem:[%s41_s1] sm:$0x1]  ;;  %s46_s28 = scalar_lea.vmem [#allocation4], %s100_s21 }
  0x15   :  { %43 = vst [vmem:[#allocation7 + $0x1] sm:$0x1] %v42_v1  ;;  %v47_v2 = vld [vmem:[%s46_s28] sm:$0x1]  ;;  %s51_s3 = scalar_lea.vmem [#allocation4], %s101_s22 }
  0x16   :  { %48 = vst [vmem:[#allocation7 + $0x2] sm:$0x1] %v47_v2  ;;  %v52_v3 = vld [vmem:[%s51_s3] sm:$0x1]  ;;  %s56_s7 = scalar_lea.vmem [#allocation4], %s102_s23 }
  0x17   :  { %53 = vst [vmem:[#allocation7 + $0x3] sm:$0x1] %v52_v3  ;;  %v57_v4 = vld [vmem:[%s56_s7] sm:$0x1]  ;;  %s61_s8 = scalar_lea.vmem [#allocation4], %s103_s24 }
  0x18   :  { %58 = vst [vmem:[#allocation7 + $0x4] sm:$0x1] %v57_v4  ;;  %v62_v5 = vld [vmem:[%s61_s8] sm:$0x1]  ;;  %s66_s9 = scalar_lea.vmem [#allocation4], %s104_s25 }
  0x19   :  { %63 = vst [vmem:[#allocation7 + $0x5] sm:$0x1] %v62_v5  ;;  %v67_v6 = vld [vmem:[%s66_s9] sm:$0x1]  ;;  %s71_s10 = scalar_lea.vmem [#allocation4], %s105_s27 }
  0x1a   :  { %68 = vst [vmem:[#allocation7 + $0x6] sm:$0x1] %v67_v6  ;;  %v72_v7 = vld [vmem:[%s71_s10] sm:$0x1] }
  0x1b   :  { %73 = vst [vmem:[#allocation7 + $0x7] sm:$0x1] %v72_v7 }
  0x1c   :  { %84 = dma.vmem_to_hbm [thread:$0]  %s80_s30, 128, %s82_s6, [#allocation6]  }
  0x1d   :  { %175 = dma.done.wait [#allocation6], 128  }
  0x1e   :  { %176 = vsyncadd [#allocation6], 4294967168 }
  0x1f   :  { %89 = vsyncpa [#allocation5], 1 }
  0x20   :  { %90 = vsyncpa [#allocation6], 1 }

</bundles_post_ra>
